<compile_context>
chip_gen: v7x
topology: tpu7x:2x2x1
jax: 0.10.0
libtpu: 0.0.40
codegen_flags: <defaults>
</compile_context>

<pallas_src>
import jax
import jax.numpy as jnp
from jax.experimental import pallas as pl
from jax.experimental.pallas import tpu as pltpu


def _round_up(x, m):
    return ((x + m - 1) // m) * m


def _mlp_kernel(x_ref, w1_ref, b1_ref, w2_ref, b2_ref, o_ref, h_ref):
    # Linear 1: (tm, H) @ (H, H2p) on the MXU with f32 accumulation.
    h = jnp.dot(x_ref[...], w1_ref[...], preferred_element_type=jnp.float32)
    # Bias + ReLU in f32.
    h = jnp.maximum(h + b1_ref[...], 0.0)
    # Stage the intermediate in VMEM scratch (keeps big row tiles off vregs).
    h_ref[...] = h
    # Linear 2: (tm, H2p) @ (H2p, Lp) on the MXU with f32 accumulation.
    out = jnp.dot(h_ref[...].astype(w2_ref.dtype), w2_ref[...],
                  preferred_element_type=jnp.float32)
    o_ref[...] = (out + b2_ref[...]).astype(o_ref.dtype)


def _build_call(out_dtype, Mp, H, H2p, Lp, tm, weight_pipeline_mode):
    wkw = {} if weight_pipeline_mode is None else {
        "pipeline_mode": weight_pipeline_mode}
    return pl.pallas_call(
        _mlp_kernel,
        out_shape=jax.ShapeDtypeStruct((Mp, Lp), out_dtype),
        grid_spec=pltpu.PrefetchScalarGridSpec(
            num_scalar_prefetch=0,
            grid=(Mp // tm,),
            in_specs=[
                pl.BlockSpec((tm, H), lambda i: (i, 0)),            # x rows (streamed)
                pl.BlockSpec((H, H2p), lambda i: (0, 0), **wkw),    # W1 (resident)
                pl.BlockSpec((1, H2p), lambda i: (0, 0), **wkw),    # b1 (resident)
                pl.BlockSpec((H2p, Lp), lambda i: (0, 0), **wkw),   # W2 (resident)
                pl.BlockSpec((1, Lp), lambda i: (0, 0), **wkw),     # b2 (resident)
            ],
            out_specs=pl.BlockSpec((tm, Lp), lambda i: (i, 0)),     # lane-dense output
            scratch_shapes=[pltpu.VMEM((tm, H2p), jnp.float32)],    # intermediate h
        ),
        compiler_params=pltpu.CompilerParams(
            dimension_semantics=("parallel",),
            vmem_limit_bytes=48 * 1024 * 1024,
        ),
    )


def multi_nonlinear_classifier(x, w1, b1, w2, b2, *, tm=256):
    """Linear -> ReLU -> Linear.  x: (..., H) -> (..., num_label)."""
    orig_shape = x.shape
    H = orig_shape[-1]
    H2 = w1.shape[1]
    L = w2.shape[1]

    x2d = x.reshape(-1, H)
    M = x2d.shape[0]

    # Lane-dense hidden/2 and label dims (multiples of 128 -> unmasked stores).
    H2p = _round_up(H2, 128)
    Lp = _round_up(L, 128)
    # Row tile: as large as useful, never larger than the (8-aligned) M.
    tm_eff = min(tm, _round_up(M, 8))
    Mp = _round_up(M, tm_eff)

    if Mp != M:
        x2d = jnp.pad(x2d, ((0, Mp - M), (0, 0)))
    w1p = jnp.pad(w1, ((0, 0), (0, H2p - H2)))
    b1p = jnp.pad(b1.astype(jnp.float32), (0, H2p - H2)).reshape(1, H2p)
    w2p = jnp.pad(w2, ((0, H2p - H2), (0, Lp - L)))
    b2p = jnp.pad(b2.astype(jnp.float32), (0, Lp - L)).reshape(1, Lp)

    args = (x2d, w1p, b1p, w2p, b2p)
    try:
        # Preferred: single-buffer the grid-invariant weights/biases.
        out2d = _build_call(x.dtype, Mp, H, H2p, Lp, tm_eff,
                            pl.Buffered(1))(*args)
    except Exception:
        # Fallback: default (double) buffering if Buffered(1) is rejected.
        out2d = _build_call(x.dtype, Mp, H, H2p, Lp, tm_eff, None)(*args)

    out2d = out2d[:M, :L]
    return out2d.reshape(*orig_shape[:-1], L)


def _reference(x, w1, b1, w2, b2):
    h = jnp.maximum(jnp.dot(x, w1) + b1, 0.0)
    return jnp.dot(h, w2) + b2


if __name__ == "__main__":
    # Small shapes consistent with the module: batch=2, seq=8, hidden=32.
    batch, seq, hidden, num_label = 2, 8, 32, 8
    hidden2 = hidden // 2

    key = jax.random.PRNGKey(0)
    k_x, k_w1, k_b1, k_w2, k_b2 = jax.random.split(key, 5)

    x = jax.random.normal(k_x, (batch, seq, hidden), dtype=jnp.float32)
    # PyTorch shapes: W1 (H2, H), W2 (L, H2); stored here transposed (in, out).
    w1 = jax.random.normal(k_w1, (hidden, hidden2), dtype=jnp.float32) * 0.1
    b1 = jax.random.normal(k_b1, (hidden2,), dtype=jnp.float32) * 0.1
    w2 = jax.random.normal(k_w2, (hidden2, num_label), dtype=jnp.float32) * 0.1
    b2 = jax.random.normal(k_b2, (num_label,), dtype=jnp.float32) * 0.1

    out = multi_nonlinear_classifier(x, w1, b1, w2, b2)
    out = jax.block_until_ready(out)

    ref = _reference(x, w1, b1, w2, b2)
    assert out.shape == (batch, seq, num_label)
    assert jnp.allclose(out, ref, atol=1e-5, rtol=1e-5)

    print("KERNEL_OK")
</pallas_src>

<mosaic_0001>
module attributes {stable_mosaic.version = 11 : i64} {
  func.func @_mlp_kernel(%arg0: i32, %arg1: memref<16x32xf32, #tpu.memory_space<vmem>>, %arg2: memref<32x128xf32, #tpu.memory_space<vmem>>, %arg3: memref<1x128xf32, #tpu.memory_space<vmem>>, %arg4: memref<128x128xf32, #tpu.memory_space<vmem>>, %arg5: memref<1x128xf32, #tpu.memory_space<vmem>>, %arg6: memref<16x128xf32, #tpu.memory_space<vmem>>, %arg7: memref<16x128xf32, #tpu.memory_space<vmem>>) attributes {dimension_semantics = [#tpu.dimension_semantics<parallel>], iteration_bounds = array<i64: 1>, scalar_prefetch = 0 : i64, scratch_operands = 1 : i64, tpu.core_type = #tpu.core_type<tc>, window_params = [{transform_indices = @transform_0, window_bounds = array<i64: 16, 32>}, {pipeline_mode = #tpu.pipeline_mode<synchronous>, transform_indices = @transform_1, window_bounds = array<i64: 32, 128>}, {pipeline_mode = #tpu.pipeline_mode<synchronous>, transform_indices = @transform_2, window_bounds = array<i64: 1, 128>}, {pipeline_mode = #tpu.pipeline_mode<synchronous>, transform_indices = @transform_3, window_bounds = array<i64: 128, 128>}, {pipeline_mode = #tpu.pipeline_mode<synchronous>, transform_indices = @transform_4, window_bounds = array<i64: 1, 128>}, {transform_indices = @transform_5, window_bounds = array<i64: 16, 128>}]} {
    %c0 = arith.constant 0 : index
    %c0_0 = arith.constant 0 : index
    %0 = vector.load %arg1[%c0, %c0_0] : memref<16x32xf32, #tpu.memory_space<vmem>>, vector<16x32xf32>
    %c0_1 = arith.constant 0 : index
    %c0_2 = arith.constant 0 : index
    %1 = vector.load %arg2[%c0_1, %c0_2] : memref<32x128xf32, #tpu.memory_space<vmem>>, vector<32x128xf32>
    %cst = arith.constant dense<0.000000e+00> : vector<16x128xf32>
    %2 = tpu.matmul %0, %1, %cst {dimension_numbers = #tpu.dot_dimension_numbers<[1], [0], [0], [1], [0, 0, 1, 1], [], []>} : vector<16x32xf32>, vector<32x128xf32>, vector<16x128xf32> -> vector<16x128xf32>
    %c0_3 = arith.constant 0 : index
    %c0_4 = arith.constant 0 : index
    %3 = vector.load %arg3[%c0_3, %c0_4] : memref<1x128xf32, #tpu.memory_space<vmem>>, vector<1x128xf32>
    %4 = vector.broadcast %3 : vector<1x128xf32> to vector<16x128xf32>
    %5 = arith.addf %2, %4 : vector<16x128xf32>
    %cst_5 = arith.constant 0.000000e+00 : f32
    %6 = vector.broadcast %cst_5 : f32 to vector<16x128xf32>
    %7 = arith.maximumf %5, %6 : vector<16x128xf32>
    %c0_6 = arith.constant 0 : index
    %c0_7 = arith.constant 0 : index
    %8 = vector.load %arg7[%c0_6, %c0_7] : memref<16x128xf32, #tpu.memory_space<vmem>>, vector<16x128xf32>
    tpu.vector_store %arg7[%c0_6, %c0_7], %7 {strides = array<i32>} : memref<16x128xf32, #tpu.memory_space<vmem>>, vector<16x128xf32>,
    %c0_8 = arith.constant 0 : index
    %c0_9 = arith.constant 0 : index
    %9 = vector.load %arg7[%c0_8, %c0_9] : memref<16x128xf32, #tpu.memory_space<vmem>>, vector<16x128xf32>
    %c0_10 = arith.constant 0 : index
    %c0_11 = arith.constant 0 : index
    %10 = vector.load %arg4[%c0_10, %c0_11] : memref<128x128xf32, #tpu.memory_space<vmem>>, vector<128x128xf32>
    %cst_12 = arith.constant dense<0.000000e+00> : vector<16x128xf32>
    %11 = tpu.matmul %9, %10, %cst_12 {dimension_numbers = #tpu.dot_dimension_numbers<[1], [0], [0], [1], [0, 0, 1, 1], [], []>} : vector<16x128xf32>, vector<128x128xf32>, vector<16x128xf32> -> vector<16x128xf32>
    %c0_13 = arith.constant 0 : index
    %c0_14 = arith.constant 0 : index
    %12 = vector.load %arg5[%c0_13, %c0_14] : memref<1x128xf32, #tpu.memory_space<vmem>>, vector<1x128xf32>
    %13 = vector.broadcast %12 : vector<1x128xf32> to vector<16x128xf32>
    %14 = arith.addf %11, %13 : vector<16x128xf32>
    %c0_15 = arith.constant 0 : index
    %c0_16 = arith.constant 0 : index
    %15 = vector.load %arg6[%c0_15, %c0_16] : memref<16x128xf32, #tpu.memory_space<vmem>>, vector<16x128xf32>
    tpu.vector_store %arg6[%c0_15, %c0_16], %14 {strides = array<i32>} : memref<16x128xf32, #tpu.memory_space<vmem>>, vector<16x128xf32>,
    return
  }
  func.func @transform_0(%arg0: i32) -> (i32, i32) {
    %c0_i32 = arith.constant 0 : i32
    %c0_i32_0 = arith.constant 0 : i32
    return %arg0, %c0_i32 : i32, i32
  }
  func.func @transform_1(%arg0: i32) -> (i32, i32) {
    %c0_i32 = arith.constant 0 : i32
    %c0_i32_0 = arith.constant 0 : i32
    %c0_i32_1 = arith.constant 0 : i32
    return %c0_i32, %c0_i32_0 : i32, i32
  }
  func.func @transform_2(%arg0: i32) -> (i32, i32) {
    %c0_i32 = arith.constant 0 : i32
    %c0_i32_0 = arith.constant 0 : i32
    %c0_i32_1 = arith.constant 0 : i32
    return %c0_i32, %c0_i32_0 : i32, i32
  }
  func.func @transform_3(%arg0: i32) -> (i32, i32) {
    %c0_i32 = arith.constant 0 : i32
    %c0_i32_0 = arith.constant 0 : i32
    %c0_i32_1 = arith.constant 0 : i32
    return %c0_i32, %c0_i32_0 : i32, i32
  }
  func.func @transform_4(%arg0: i32) -> (i32, i32) {
    %c0_i32 = arith.constant 0 : i32
    %c0_i32_0 = arith.constant 0 : i32
    %c0_i32_1 = arith.constant 0 : i32
    return %c0_i32, %c0_i32_0 : i32, i32
  }
  func.func @transform_5(%arg0: i32) -> (i32, i32) {
    %c0_i32 = arith.constant 0 : i32
    %c0_i32_0 = arith.constant 0 : i32
    return %arg0, %c0_i32 : i32, i32
  }
}

module attributes {stable_mosaic.version = 11 : i64} {
  func.func @_mlp_kernel(%arg0: i32, %arg1: memref<16x32xf32, #tpu.memory_space<vmem>>, %arg2: memref<32x128xf32, #tpu.memory_space<vmem>>, %arg3: memref<1x128xf32, #tpu.memory_space<vmem>>, %arg4: memref<128x128xf32, #tpu.memory_space<vmem>>, %arg5: memref<1x128xf32, #tpu.memory_space<vmem>>, %arg6: memref<16x128xf32, #tpu.memory_space<vmem>>, %arg7: memref<16x128xf32, #tpu.memory_space<vmem>>) attributes {dimension_semantics = [#tpu.dimension_semantics<parallel>], iteration_bounds = array<i64: 1>, scalar_prefetch = 0 : i64, scratch_operands = 1 : i64, tpu.core_type = #tpu.core_type<tc>, window_params = [{transform_indices = @transform_0, window_bounds = array<i64: 16, 32>}, {pipeline_mode = #tpu.pipeline_mode<synchronous>, transform_indices = @transform_1, window_bounds = array<i64: 32, 128>}, {pipeline_mode = #tpu.pipeline_mode<synchronous>, transform_indices = @transform_2, window_bounds = array<i64: 1, 128>}, {pipeline_mode = #tpu.pipeline_mode<synchronous>, transform_indices = @transform_3, window_bounds = array<i64: 128, 128>}, {pipeline_mode = #tpu.pipeline_mode<synchronous>, transform_indices = @transform_4, window_bounds = array<i64: 1, 128>}, {transform_indices = @transform_5, window_bounds = array<i64: 16, 128>}]} {
    %c0 = arith.constant 0 : index
    %c0_0 = arith.constant 0 : index
    %0 = vector.load %arg1[%c0, %c0_0] : memref<16x32xf32, #tpu.memory_space<vmem>>, vector<16x32xf32>
    %c0_1 = arith.constant 0 : index
    %c0_2 = arith.constant 0 : index
    %1 = vector.load %arg2[%c0_1, %c0_2] : memref<32x128xf32, #tpu.memory_space<vmem>>, vector<32x128xf32>
    %cst = arith.constant dense<0.000000e+00> : vector<16x128xf32>
    %2 = tpu.matmul %0, %1, %cst {dimension_numbers = #tpu.dot_dimension_numbers<[1], [0], [0], [1], [0, 0, 1, 1], [], []>} : vector<16x32xf32>, vector<32x128xf32>, vector<16x128xf32> -> vector<16x128xf32>
    %c0_3 = arith.constant 0 : index
    %c0_4 = arith.constant 0 : index
    %3 = vector.load %arg3[%c0_3, %c0_4] : memref<1x128xf32, #tpu.memory_space<vmem>>, vector<1x128xf32>
    %4 = vector.broadcast %3 : vector<1x128xf32> to vector<16x128xf32>
    %5 = arith.addf %2, %4 : vector<16x128xf32>
    %cst_5 = arith.constant 0.000000e+00 : f32
    %6 = vector.broadcast %cst_5 : f32 to vector<16x128xf32>
    %7 = arith.maximumf %5, %6 : vector<16x128xf32>
    %c0_6 = arith.constant 0 : index
    %c0_7 = arith.constant 0 : index
    %8 = vector.load %arg7[%c0_6, %c0_7] : memref<16x128xf32, #tpu.memory_space<vmem>>, vector<16x128xf32>
    tpu.vector_store %arg7[%c0_6, %c0_7], %7 {strides = array<i32>} : memref<16x128xf32, #tpu.memory_space<vmem>>, vector<16x128xf32>,
    %c0_8 = arith.constant 0 : index
    %c0_9 = arith.constant 0 : index
    %9 = vector.load %arg7[%c0_8, %c0_9] : memref<16x128xf32, #tpu.memory_space<vmem>>, vector<16x128xf32>
    %c0_10 = arith.constant 0 : index
    %c0_11 = arith.constant 0 : index
    %10 = vector.load %arg4[%c0_10, %c0_11] : memref<128x128xf32, #tpu.memory_space<vmem>>, vector<128x128xf32>
    %cst_12 = arith.constant dense<0.000000e+00> : vector<16x128xf32>
    %11 = tpu.matmul %9, %10, %cst_12 {dimension_numbers = #tpu.dot_dimension_numbers<[1], [0], [0], [1], [0, 0, 1, 1], [], []>} : vector<16x128xf32>, vector<128x128xf32>, vector<16x128xf32> -> vector<16x128xf32>
    %c0_13 = arith.constant 0 : index
    %c0_14 = arith.constant 0 : index
    %12 = vector.load %arg5[%c0_13, %c0_14] : memref<1x128xf32, #tpu.memory_space<vmem>>, vector<1x128xf32>
    %13 = vector.broadcast %12 : vector<1x128xf32> to vector<16x128xf32>
    %14 = arith.addf %11, %13 : vector<16x128xf32>
    %c0_15 = arith.constant 0 : index
    %c0_16 = arith.constant 0 : index
    %15 = vector.load %arg6[%c0_15, %c0_16] : memref<16x128xf32, #tpu.memory_space<vmem>>, vector<16x128xf32>
    tpu.vector_store %arg6[%c0_15, %c0_16], %14 {strides = array<i32>} : memref<16x128xf32, #tpu.memory_space<vmem>>, vector<16x128xf32>,
    return
  }
  func.func @transform_0(%arg0: i32) -> (i32, i32) {
    %c0_i32 = arith.constant 0 : i32
    %c0_i32_0 = arith.constant 0 : i32
    return %arg0, %c0_i32 : i32, i32
  }
  func.func @transform_1(%arg0: i32) -> (i32, i32) {
    %c0_i32 = arith.constant 0 : i32
    %c0_i32_0 = arith.constant 0 : i32
    %c0_i32_1 = arith.constant 0 : i32
    return %c0_i32, %c0_i32_0 : i32, i32
  }
  func.func @transform_2(%arg0: i32) -> (i32, i32) {
    %c0_i32 = arith.constant 0 : i32
    %c0_i32_0 = arith.constant 0 : i32
    %c0_i32_1 = arith.constant 0 : i32
    return %c0_i32, %c0_i32_0 : i32, i32
  }
  func.func @transform_3(%arg0: i32) -> (i32, i32) {
    %c0_i32 = arith.constant 0 : i32
    %c0_i32_0 = arith.constant 0 : i32
    %c0_i32_1 = arith.constant 0 : i32
    return %c0_i32, %c0_i32_0 : i32, i32
  }
  func.func @transform_4(%arg0: i32) -> (i32, i32) {
    %c0_i32 = arith.constant 0 : i32
    %c0_i32_0 = arith.constant 0 : i32
    %c0_i32_1 = arith.constant 0 : i32
    return %c0_i32, %c0_i32_0 : i32, i32
  }
  func.func @transform_5(%arg0: i32) -> (i32, i32) {
    %c0_i32 = arith.constant 0 : i32
    %c0_i32_0 = arith.constant 0 : i32
    return %arg0, %c0_i32 : i32, i32
  }
}

</mosaic_0001>

<bundles_post_ra>
// kernel: tpu_custom_call.1
= control target key start
LH: loop header
LB: loop body
LE: loop exit
PB: predicated region body
PF: predicated region fallthrough
CT: control target
= control target key end

     0   :  { %10 = vsyncpa [#allocation4], 0  ;;  %s606_s0 = inlined_call_operand.hbm [shape: f32[16,32], index: 0, kind: input, shape index: {}]   ;;  %s607_s1 = inlined_call_operand.hbm [shape: f32[32,128], index: 1, kind: input, shape index: {}]   ;;  %s608_s2 = inlined_call_operand.vmem [shape: f32[1,128], index: 2, kind: input, shape index: {}]   ;;  %s609_s3 = inlined_call_operand.hbm [shape: f32[128,128], index: 3, kind: input, shape index: {}]   ;;  %s610_s4 = inlined_call_operand.vmem [shape: f32[1,128], index: 4, kind: input, shape index: {}]   ;;  %s611_s5 = inlined_call_operand.hbm [shape: f32[16,128], index: 5, kind: output, shape index: {}]  }
   0x1   :  { %11 = vsyncpa [#allocation7], 0 }
   0x2   :  { %12 = vsyncpa [#allocation5], 0  ;;  %s495_s18 = smov [#allocation6]   ;;  %s496_s20 = smov [#allocation3]  }
   0x3   :  { %s30_s19 = sshll.u32 %s495_s18, 4  ;;  %s18_s21 = sshll.u32 %s496_s20, 4  ;;  %s31_s19 = int_to_ptr.vmem [resolvable:$true] %s30_s19  ;;  %s531_s21 = int_to_ptr.vmem [resolvable:$true] %s18_s21 }
   0x4   :  { %s401_s24 = scalar_lea.hbm %s607_s1, 512 }
   0x5   :  { %p402_p0 = scmp.ne.s32.totalorder %s607_s1, %s401_s24  ;;  %p405_p1 = scmp.lt.u32.totalorder %s401_s24, %s607_s1 }
   0x7   :  { %p407_p2 = pnand %p405_p1, %p402_p0 }
   0x9   :  { %410 = shalt.err (!%p407_p2)
}
   0xa   :  { %s411_s29 = scalar_lea.vmem %s31_s19, 512  ;;  %p416_p4 = scmp.lt.s32.totalorder %s31_s19, %s31_s19 }
   0xb   :  { %p412_p3 = scmp.ne.s32.totalorder %s31_s19, %s411_s29  ;;  %p417_p5 = scmp.lt.s32.totalorder %s411_s29, %s411_s29 }
   0xd   :  { %p418_p6 = por %p417_p5, %p416_p4 }
   0xf   :  { %p419_p7 = pnand %p418_p6, %p412_p3 }
  0x11   :  { %422 = shalt.err (!%p419_p7)
}
  0x12   :  { %s497_s30 = smov 128   ;;  %s498_s6 = smov 8  }
  0x13   :  { %36 = dma.hbm_to_vmem [thread:$0]  %s607_s1, 512, %s31_s19, [#allocation7], %s497_s30, %s497_s30, %s498_s6  }
  0x14   :  { %s423_s11 = scalar_lea.hbm %s606_s0, 256 }
  0x15   :  { %p424_p8 = scmp.ne.s32.totalorder %s606_s0, %s423_s11  ;;  %p427_p9 = scmp.lt.u32.totalorder %s423_s11, %s606_s0 }
  0x17   :  { %p429_p10 = pnand %p427_p9, %p424_p8 }
  0x19   :  { %432 = shalt.err (!%p429_p10)
}
  0x1a   :  { %s433_s16 = scalar_lea.vmem %s531_s21, 256  ;;  %p438_p12 = scmp.lt.s32.totalorder %s531_s21, %s531_s21 }
  0x1b   :  { %p434_p11 = scmp.ne.s32.totalorder %s531_s21, %s433_s16  ;;  %p439_p13 = scmp.lt.s32.totalorder %s433_s16, %s433_s16 }
  0x1d   :  { %p440_p0 = por %p439_p13, %p438_p12 }
  0x1f   :  { %p441_p1 = pnand %p440_p0, %p434_p11 }
  0x21   :  { %444 = shalt.err (!%p441_p1)
}
  0x22   :  { %24 = dma.hbm_to_vmem [thread:$0]  %s606_s0, 256, %s531_s21, [#allocation4], %s497_s30, %s497_s30, %s498_s6  }
  0x23   :  { %s499_s18 = smov [#allocation8]   ;;  %s445_s23 = scalar_lea.hbm %s609_s3, 2048 }
  0x24   :  { %s44_s19 = sshll.u32 %s499_s18, 4  ;;  %p446_p2 = scmp.ne.s32.totalorder %s609_s3, %s445_s23  ;;  %s45_s19 = int_to_ptr.vmem [resolvable:$true] %s44_s19 }
  0x25   :  { %p449_p3 = scmp.lt.u32.totalorder %s445_s23, %s609_s3 }
  0x27   :  { %p451_p4 = pnand %p449_p3, %p446_p2 }
  0x29   :  { %454 = shalt.err (!%p451_p4)
}
  0x2a   :  { %s455_s28 = scalar_lea.vmem %s45_s19, 2048  ;;  %p460_p6 = scmp.lt.s32.totalorder %s45_s19, %s45_s19 }
  0x2b   :  { %p456_p5 = scmp.ne.s32.totalorder %s45_s19, %s455_s28  ;;  %p461_p7 = scmp.lt.s32.totalorder %s455_s28, %s455_s28 }
  0x2d   :  { %p462_p8 = por %p461_p7, %p460_p6 }
  0x2f   :  { %p463_p9 = pnand %p462_p8, %p456_p5 }
  0x31   :  { %466 = shalt.err (!%p463_p9)
}
  0x32   :  { %50 = dma.hbm_to_vmem [thread:$0]  %s609_s3, 2048, %s45_s19, [#allocation7], %s497_s30, %s497_s30, %s498_s6  }
  0x33   :  { %489 = dma.done.wait [#allocation4], 256  }
  0x34   :  { %490 = vsyncadd [#allocation4], 4294967040 }
  0x35   :  { %491 = dma.done.wait [#allocation7], 2560  }
  0x36   :  { %492 = vsyncadd [#allocation7], 4294964736  ;;  %vm75_vm0 = vcmask 261120   ;;  %v64_v0 = vld [vmem:[#allocation6] sm:$0xff]  ;;  %v65_v1 = vld [vmem:[#allocation6 + $0x8] sm:$0xff]  ;;  %s500_s9 = smov [#allocation9]  }
  0x37   :  { %v66_v2 = vld [vmem:[#allocation6 + $0x10] sm:$0xff]  ;;  %v355_v3 = vpack.c.bf16 %v65_v1, %v64_v0  ;;  %v67_v4 = vld [vmem:[#allocation6 + $0x18] sm:$0xff]  ;;  %v163_v7 = vld [vmem:[#allocation8] sm:$0xff]  ;;  %s268_s10 = sshll.u32 %s500_s9, 4  ;;  %s269_s10 = int_to_ptr.vmem [resolvable:$true] %s268_s10 }
  0x38   :  { %v62_v5 = vld [vmem:[#allocation3] sm:$0xff]  ;;  %v359_v6 = vpack.c.bf16 %v67_v4, %v66_v2  ;;  %v164_v8 = vld [vmem:[#allocation8 + $0x8] sm:$0xff]  ;;  %v166_v11 = vld [vmem:[#allocation8 + $0x18] sm:$0xff]  ;;  %p472_p11 = scmp.lt.s32.totalorder %s269_s10, %s269_s10 }
  0x39   :  { %317 = vmatprep.mubr.msk.f32.mxu0 %vm75_vm0, %v62_v5  ;;  %v165_v9 = vld [vmem:[#allocation8 + $0x10] sm:$0xff]  ;;  %356 = vmatprep.subr.bf16.mxu0 %v355_v3  ;;  %v363_v10 = vpack.c.bf16 %v164_v8, %v163_v7  ;;  %v167_v13 = vld [vmem:[#allocation8 + $0x20] sm:$0xff]  ;;  %v168_v14 = vld [vmem:[#allocation8 + $0x28] sm:$0xff] }
  0x3a   :  { %358 = vmatpush3.bf16.msra.mxu0 %v355_v3  ;;  %v367_v12 = vpack.c.bf16 %v166_v11, %v165_v9  ;;  %v371_v15 = vpack.c.bf16 %v168_v14, %v167_v13  ;;  %v63_v16 = vld [vmem:[#allocation3 + $0x8] sm:$0xff]  ;;  %v169_v17 = vld [vmem:[#allocation8 + $0x30] sm:$0xff]  ;;  %v171_v20 = vld [vmem:[#allocation8 + $0x40] sm:$0xff] }
  0x3b   :  { %360 = vmatprep.subr.bf16.mxu0 %v359_v6  ;;  %364 = vmatprep.subr.bf16.mxu1 %v363_v10  ;;  %v170_v18 = vld [vmem:[#allocation8 + $0x38] sm:$0xff]  ;;  %v172_v21 = vld [vmem:[#allocation8 + $0x48] sm:$0xff]  ;;  %v173_v23 = vld [vmem:[#allocation8 + $0x50] sm:$0xff] }
  0x3c   :  { %366 = vmatpush3.bf16.msra.mxu1 %v363_v10  ;;  %v375_v19 = vpack.c.bf16 %v170_v18, %v169_v17  ;;  %v379_v22 = vpack.c.bf16 %v172_v21, %v171_v20  ;;  %v174_v24 = vld [vmem:[#allocation8 + $0x58] sm:$0xff]  ;;  %v175_v26 = vld [vmem:[#allocation8 + $0x60] sm:$0xff]  ;;  %v176_v27 = vld [vmem:[#allocation8 + $0x68] sm:$0xff] }
  0x3d   :  { %368 = vmatprep.subr.bf16.mxu1 %v367_v12  ;;  %v383_v25 = vpack.c.bf16 %v174_v24, %v173_v23  ;;  %v387_v28 = vpack.c.bf16 %v176_v27, %v175_v26  ;;  %v177_v29 = vld [vmem:[#allocation8 + $0x70] sm:$0xff]  ;;  %v178_v30 = vld [vmem:[#allocation8 + $0x78] sm:$0xff] }
  0x3e   :  { %362 = vmatpush3.bf16.msra.mxu0 %v359_v6  ;;  %v391_v31 = vpack.c.bf16 %v178_v30, %v177_v29  ;;  %v281_v32 = vld [vmem:[%s608_s2] ss:$0 sm:$0xff]  ;;  %s467_s2 = scalar_lea.vmem %s269_s10, 256 }
  0x3f   :  { %v284_v39 = vld [vmem:[%s610_s4] ss:$0 sm:$0xff]  ;;  %p468_p10 = scmp.ne.s32.totalorder %s269_s10, %s467_s2  ;;  %p473_p12 = scmp.lt.s32.totalorder %s467_s2, %s467_s2 }
  0x40   :  { %370 = vmatpush3.bf16.msra.mxu1 %v367_v12 }
  0x41   :  { %318 = vmatmul.mubr.msk.f32.vlgmr.msra.gmra.mrb[0].mxu0 %vm75_vm0, %v63_v16  ;;  %372 = vmatprep.subr.bf16.mxu1 %v371_v15  ;;  %p474_p13 = por %p473_p12, %p472_p11 }
  0x43   :  { %p475_p0 = pnand %p474_p13, %p468_p10 }
  0x44   :  { %374 = vmatpush3.bf16.msra.mxu1 %v371_v15 }
  0x45   :  { %376 = vmatprep.subr.bf16.mxu1 %v375_v19 }
  0x48   :  { %378 = vmatpush3.bf16.msra.mxu1 %v375_v19 }
  0x49   :  { %380 = vmatprep.subr.bf16.mxu1 %v379_v22 }
  0x4c   :  { %382 = vmatpush3.bf16.msra.mxu1 %v379_v22 }
  0x4d   :  { %384 = vmatprep.subr.bf16.mxu1 %v383_v25 }
  0x50   :  { %386 = vmatpush3.bf16.msra.mxu1 %v383_v25 }
  0x51   :  { %388 = vmatprep.subr.bf16.mxu1 %v387_v28 }
  0x54   :  { %390 = vmatpush3.bf16.msra.mxu1 %v387_v28 }
  0x55   :  { %392 = vmatprep.subr.bf16.mxu1 %v391_v31 }
  0x58   :  { %394 = vmatpush3.bf16.msra.mxu1 %v391_v31 }
 0x114   :  { %v319_v33 = vpop.f32.mrb[0].mxu0 }
 0x115   :  { %v154_v34 = vadd.f32 %v319_v33, %v281_v32  ;;  %v148_v35 = vpop.f32.mrb[1].mxu0 }
 0x116   :  { %v149_v36 = vadd.f32 %v281_v32, %v148_v35 }
 0x117   :  { %v158_v38 = vmax.f32 %v154_v34, 0.0 }
 0x118   :  { %v157_v37 = vmax.f32 %v149_v36, 0.0 }
 0x11a   :  { %352 = vmatprep.mubr.f32.mxu1 %v157_v37 }
 0x11b   :  { %353 = vmatmul.mubr.f32.vlgmr.msra.gmra.mrb[0].mxu1 %v158_v38 }
 0x1ee   :  { %v354_v40 = vpop.f32.mrb[0].mxu1 }
 0x1ef   :  { %v258_v41 = vadd.f32 %v354_v40, %v284_v39  ;;  %v252_v42 = vpop.f32.mrb[1].mxu1 }
 0x1f0   :  { %v253_v43 = vadd.f32 %v284_v39, %v252_v42 }
 0x1f1   :  { %262 = vst [vmem:[#allocation9 + $0x8] sm:$0xff] %v258_v41 }
 0x1f2   :  { %261 = vst [vmem:[#allocation9] sm:$0xff] %v253_v43 }
 0x1f3   :  { %478 = shalt.err (!%p475_p0)
}
 0x1f4   :  { %s479_s4 = scalar_lea.hbm %s611_s5, 256 }
 0x1f5   :  { %p480_p1 = scmp.ne.s32.totalorder %s611_s5, %s479_s4  ;;  %p483_p2 = scmp.lt.u32.totalorder %s479_s4, %s611_s5 }
 0x1f7   :  { %p485_p3 = pnand %p483_p2, %p480_p1 }
 0x1f9   :  { %488 = shalt.err (!%p485_p3)
}
 0x1fa   :  { %274 = dma.vmem_to_hbm [thread:$0]  %s269_s10, 256, %s611_s5, [#allocation5], %s497_s30, %s497_s30, %s498_s6  }
 0x1fb   :  { %493 = dma.done.wait [#allocation5], 256  }
 0x1fc   :  { %494 = vsyncadd [#allocation5], 4294967040 }
 0x1fd   :  { %278 = vsyncpa [#allocation4], 1 }
 0x1fe   :  { %279 = vsyncpa [#allocation7], 1 }
 0x1ff   :  { %280 = vsyncpa [#allocation5], 1 }

// kernel: tpu_custom_call.1
= control target key start
LH: loop header
LB: loop body
LE: loop exit
PB: predicated region body
PF: predicated region fallthrough
CT: control target
= control target key end

     0   :  { %10 = vsyncpa [#allocation4], 0  ;;  %s606_s0 = inlined_call_operand.hbm [shape: f32[16,32], index: 0, kind: input, shape index: {}]   ;;  %s607_s1 = inlined_call_operand.hbm [shape: f32[32,128], index: 1, kind: input, shape index: {}]   ;;  %s608_s2 = inlined_call_operand.vmem [shape: f32[1,128], index: 2, kind: input, shape index: {}]   ;;  %s609_s3 = inlined_call_operand.hbm [shape: f32[128,128], index: 3, kind: input, shape index: {}]   ;;  %s610_s4 = inlined_call_operand.vmem [shape: f32[1,128], index: 4, kind: input, shape index: {}]   ;;  %s611_s5 = inlined_call_operand.hbm [shape: f32[16,128], index: 5, kind: output, shape index: {}]  }
   0x1   :  { %11 = vsyncpa [#allocation7], 0 }
   0x2   :  { %12 = vsyncpa [#allocation5], 0  ;;  %s495_s18 = smov [#allocation6]   ;;  %s496_s20 = smov [#allocation3]  }
   0x3   :  { %s30_s19 = sshll.u32 %s495_s18, 4  ;;  %s18_s21 = sshll.u32 %s496_s20, 4  ;;  %s31_s19 = int_to_ptr.vmem [resolvable:$true] %s30_s19  ;;  %s531_s21 = int_to_ptr.vmem [resolvable:$true] %s18_s21 }
   0x4   :  { %s401_s24 = scalar_lea.hbm %s607_s1, 512 }
   0x5   :  { %p402_p0 = scmp.ne.s32.totalorder %s607_s1, %s401_s24  ;;  %p405_p1 = scmp.lt.u32.totalorder %s401_s24, %s607_s1 }
   0x7   :  { %p407_p2 = pnand %p405_p1, %p402_p0 }
   0x9   :  { %410 = shalt.err (!%p407_p2)
}
   0xa   :  { %s411_s29 = scalar_lea.vmem %s31_s19, 512  ;;  %p416_p4 = scmp.lt.s32.totalorder %s31_s19, %s31_s19 }
   0xb   :  { %p412_p3 = scmp.ne.s32.totalorder %s31_s19, %s411_s29  ;;  %p417_p5 = scmp.lt.s32.totalorder %s411_s29, %s411_s29 }
   0xd   :  { %p418_p6 = por %p417_p5, %p416_p4 }
   0xf   :  { %p419_p7 = pnand %p418_p6, %p412_p3 }
  0x11   :  { %422 = shalt.err (!%p419_p7)
}
  0x12   :  { %s497_s30 = smov 128   ;;  %s498_s6 = smov 8  }
  0x13   :  { %36 = dma.hbm_to_vmem [thread:$0]  %s607_s1, 512, %s31_s19, [#allocation7], %s497_s30, %s497_s30, %s498_s6  }
  0x14   :  { %s423_s11 = scalar_lea.hbm %s606_s0, 256 }
  0x15   :  { %p424_p8 = scmp.ne.s32.totalorder %s606_s0, %s423_s11  ;;  %p427_p9 = scmp.lt.u32.totalorder %s423_s11, %s606_s0 }
  0x17   :  { %p429_p10 = pnand %p427_p9, %p424_p8 }
  0x19   :  { %432 = shalt.err (!%p429_p10)
}
  0x1a   :  { %s433_s16 = scalar_lea.vmem %s531_s21, 256  ;;  %p438_p12 = scmp.lt.s32.totalorder %s531_s21, %s531_s21 }
  0x1b   :  { %p434_p11 = scmp.ne.s32.totalorder %s531_s21, %s433_s16  ;;  %p439_p13 = scmp.lt.s32.totalorder %s433_s16, %s433_s16 }
  0x1d   :  { %p440_p0 = por %p439_p13, %p438_p12 }
  0x1f   :  { %p441_p1 = pnand %p440_p0, %p434_p11 }
  0x21   :  { %444 = shalt.err (!%p441_p1)
}
  0x22   :  { %24 = dma.hbm_to_vmem [thread:$0]  %s606_s0, 256, %s531_s21, [#allocation4], %s497_s30, %s497_s30, %s498_s6  }
  0x23   :  { %s499_s18 = smov [#allocation8]   ;;  %s445_s23 = scalar_lea.hbm %s609_s3, 2048 }
  0x24   :  { %s44_s19 = sshll.u32 %s499_s18, 4  ;;  %p446_p2 = scmp.ne.s32.totalorder %s609_s3, %s445_s23  ;;  %s45_s19 = int_to_ptr.vmem [resolvable:$true] %s44_s19 }
  0x25   :  { %p449_p3 = scmp.lt.u32.totalorder %s445_s23, %s609_s3 }
  0x27   :  { %p451_p4 = pnand %p449_p3, %p446_p2 }
  0x29   :  { %454 = shalt.err (!%p451_p4)
}
  0x2a   :  { %s455_s28 = scalar_lea.vmem %s45_s19, 2048  ;;  %p460_p6 = scmp.lt.s32.totalorder %s45_s19, %s45_s19 }
  0x2b   :  { %p456_p5 = scmp.ne.s32.totalorder %s45_s19, %s455_s28  ;;  %p461_p7 = scmp.lt.s32.totalorder %s455_s28, %s455_s28 }
  0x2d   :  { %p462_p8 = por %p461_p7, %p460_p6 }
  0x2f   :  { %p463_p9 = pnand %p462_p8, %p456_p5 }
  0x31   :  { %466 = shalt.err (!%p463_p9)
}
  0x32   :  { %50 = dma.hbm_to_vmem [thread:$0]  %s609_s3, 2048, %s45_s19, [#allocation7], %s497_s30, %s497_s30, %s498_s6  }
  0x33   :  { %489 = dma.done.wait [#allocation4], 256  }
  0x34   :  { %490 = vsyncadd [#allocation4], 4294967040 }
  0x35   :  { %491 = dma.done.wait [#allocation7], 2560  }
  0x36   :  { %492 = vsyncadd [#allocation7], 4294964736  ;;  %vm75_vm0 = vcmask 261120   ;;  %v64_v0 = vld [vmem:[#allocation6] sm:$0xff]  ;;  %v65_v1 = vld [vmem:[#allocation6 + $0x8] sm:$0xff]  ;;  %s500_s9 = smov [#allocation9]  }
  0x37   :  { %v66_v2 = vld [vmem:[#allocation6 + $0x10] sm:$0xff]  ;;  %v355_v3 = vpack.c.bf16 %v65_v1, %v64_v0  ;;  %v67_v4 = vld [vmem:[#allocation6 + $0x18] sm:$0xff]  ;;  %v163_v7 = vld [vmem:[#allocation8] sm:$0xff]  ;;  %s268_s10 = sshll.u32 %s500_s9, 4  ;;  %s269_s10 = int_to_ptr.vmem [resolvable:$true] %s268_s10 }
  0x38   :  { %v62_v5 = vld [vmem:[#allocation3] sm:$0xff]  ;;  %v359_v6 = vpack.c.bf16 %v67_v4, %v66_v2  ;;  %v164_v8 = vld [vmem:[#allocation8 + $0x8] sm:$0xff]  ;;  %v166_v11 = vld [vmem:[#allocation8 + $0x18] sm:$0xff]  ;;  %p472_p11 = scmp.lt.s32.totalorder %s269_s10, %s269_s10 }
  0x39   :  { %317 = vmatprep.mubr.msk.f32.mxu0 %vm75_vm0, %v62_v5  ;;  %v165_v9 = vld [vmem:[#allocation8 + $0x10] sm:$0xff]  ;;  %356 = vmatprep.subr.bf16.mxu0 %v355_v3  ;;  %v363_v10 = vpack.c.bf16 %v164_v8, %v163_v7  ;;  %v167_v13 = vld [vmem:[#allocation8 + $0x20] sm:$0xff]  ;;  %v168_v14 = vld [vmem:[#allocation8 + $0x28] sm:$0xff] }
  0x3a   :  { %358 = vmatpush3.bf16.msra.mxu0 %v355_v3  ;;  %v367_v12 = vpack.c.bf16 %v166_v11, %v165_v9  ;;  %v371_v15 = vpack.c.bf16 %v168_v14, %v167_v13  ;;  %v63_v16 = vld [vmem:[#allocation3 + $0x8] sm:$0xff]  ;;  %v169_v17 = vld [vmem:[#allocation8 + $0x30] sm:$0xff]  ;;  %v171_v20 = vld [vmem:[#allocation8 + $0x40] sm:$0xff] }
  0x3b   :  { %360 = vmatprep.subr.bf16.mxu0 %v359_v6  ;;  %364 = vmatprep.subr.bf16.mxu1 %v363_v10  ;;  %v170_v18 = vld [vmem:[#allocation8 + $0x38] sm:$0xff]  ;;  %v172_v21 = vld [vmem:[#allocation8 + $0x48] sm:$0xff]  ;;  %v173_v23 = vld [vmem:[#allocation8 + $0x50] sm:$0xff] }
  0x3c   :  { %366 = vmatpush3.bf16.msra.mxu1 %v363_v10  ;;  %v375_v19 = vpack.c.bf16 %v170_v18, %v169_v17  ;;  %v379_v22 = vpack.c.bf16 %v172_v21, %v171_v20  ;;  %v174_v24 = vld [vmem:[#allocation8 + $0x58] sm:$0xff]  ;;  %v175_v26 = vld [vmem:[#allocation8 + $0x60] sm:$0xff]  ;;  %v176_v27 = vld [vmem:[#allocation8 + $0x68] sm:$0xff] }
  0x3d   :  { %368 = vmatprep.subr.bf16.mxu1 %v367_v12  ;;  %v383_v25 = vpack.c.bf16 %v174_v24, %v173_v23  ;;  %v387_v28 = vpack.c.bf16 %v176_v27, %v175_v26  ;;  %v177_v29 = vld [vmem:[#allocation8 + $0x70] sm:$0xff]  ;;  %v178_v30 = vld [vmem:[#allocation8 + $0x78] sm:$0xff] }
  0x3e   :  { %362 = vmatpush3.bf16.msra.mxu0 %v359_v6  ;;  %v391_v31 = vpack.c.bf16 %v178_v30, %v177_v29  ;;  %v281_v32 = vld [vmem:[%s608_s2] ss:$0 sm:$0xff]  ;;  %s467_s2 = scalar_lea.vmem %s269_s10, 256 }
  0x3f   :  { %v284_v39 = vld [vmem:[%s610_s4] ss:$0 sm:$0xff]  ;;  %p468_p10 = scmp.ne.s32.totalorder %s269_s10, %s467_s2  ;;  %p473_p12 = scmp.lt.s32.totalorder %s467_s2, %s467_s2 }
  0x40   :  { %370 = vmatpush3.bf16.msra.mxu1 %v367_v12 }
  0x41   :  { %318 = vmatmul.mubr.msk.f32.vlgmr.msra.gmra.mrb[0].mxu0 %vm75_vm0, %v63_v16  ;;  %372 = vmatprep.subr.bf16.mxu1 %v371_v15  ;;  %p474_p13 = por %p473_p12, %p472_p11 }
  0x43   :  { %p475_p0 = pnand %p474_p13, %p468_p10 }
  0x44   :  { %374 = vmatpush3.bf16.msra.mxu1 %v371_v15 }
  0x45   :  { %376 = vmatprep.subr.bf16.mxu1 %v375_v19 }
  0x48   :  { %378 = vmatpush3.bf16.msra.mxu1 %v375_v19 }
  0x49   :  { %380 = vmatprep.subr.bf16.mxu1 %v379_v22 }
  0x4c   :  { %382 = vmatpush3.bf16.msra.mxu1 %v379_v22 }
  0x4d   :  { %384 = vmatprep.subr.bf16.mxu1 %v383_v25 }
  0x50   :  { %386 = vmatpush3.bf16.msra.mxu1 %v383_v25 }
  0x51   :  { %388 = vmatprep.subr.bf16.mxu1 %v387_v28 }
  0x54   :  { %390 = vmatpush3.bf16.msra.mxu1 %v387_v28 }
  0x55   :  { %392 = vmatprep.subr.bf16.mxu1 %v391_v31 }
  0x58   :  { %394 = vmatpush3.bf16.msra.mxu1 %v391_v31 }
 0x114   :  { %v319_v33 = vpop.f32.mrb[0].mxu0 }
 0x115   :  { %v154_v34 = vadd.f32 %v319_v33, %v281_v32  ;;  %v148_v35 = vpop.f32.mrb[1].mxu0 }
 0x116   :  { %v149_v36 = vadd.f32 %v281_v32, %v148_v35 }
 0x117   :  { %v158_v38 = vmax.f32 %v154_v34, 0.0 }
 0x118   :  { %v157_v37 = vmax.f32 %v149_v36, 0.0 }
 0x11a   :  { %352 = vmatprep.mubr.f32.mxu1 %v157_v37 }
 0x11b   :  { %353 = vmatmul.mubr.f32.vlgmr.msra.gmra.mrb[0].mxu1 %v158_v38 }
 0x1ee   :  { %v354_v40 = vpop.f32.mrb[0].mxu1 }
 0x1ef   :  { %v258_v41 = vadd.f32 %v354_v40, %v284_v39  ;;  %v252_v42 = vpop.f32.mrb[1].mxu1 }
 0x1f0   :  { %v253_v43 = vadd.f32 %v284_v39, %v252_v42 }
 0x1f1   :  { %262 = vst [vmem:[#allocation9 + $0x8] sm:$0xff] %v258_v41 }
 0x1f2   :  { %261 = vst [vmem:[#allocation9] sm:$0xff] %v253_v43 }
 0x1f3   :  { %478 = shalt.err (!%p475_p0)
}
 0x1f4   :  { %s479_s4 = scalar_lea.hbm %s611_s5, 256 }
 0x1f5   :  { %p480_p1 = scmp.ne.s32.totalorder %s611_s5, %s479_s4  ;;  %p483_p2 = scmp.lt.u32.totalorder %s479_s4, %s611_s5 }
 0x1f7   :  { %p485_p3 = pnand %p483_p2, %p480_p1 }
 0x1f9   :  { %488 = shalt.err (!%p485_p3)
}
 0x1fa   :  { %274 = dma.vmem_to_hbm [thread:$0]  %s269_s10, 256, %s611_s5, [#allocation5], %s497_s30, %s497_s30, %s498_s6  }
 0x1fb   :  { %493 = dma.done.wait [#allocation5], 256  }
 0x1fc   :  { %494 = vsyncadd [#allocation5], 4294967040 }
 0x1fd   :  { %278 = vsyncpa [#allocation4], 1 }
 0x1fe   :  { %279 = vsyncpa [#allocation7], 1 }
 0x1ff   :  { %280 = vsyncpa [#allocation5], 1 }

</bundles_post_ra>
